<compile_context>
chip_gen: v7x
topology: tpu7x:2x2x1
jax: 0.10.0
libtpu: 0.0.40
codegen_flags: <defaults>
</compile_context>

<pallas_src>
import jax
import jax.numpy as jnp
from jax.experimental import pallas as pl
from jax.experimental.pallas import tpu as pltpu


def _dma_copy_kernel(x_hbm, o_hbm, sems):
    """Direct HBM->HBM copy: chunk i of x -> chunk i of o, DMAs overlapped."""
    n_chunks = x_hbm.shape[0]          # static (<= _MAX_OUTSTANDING_DMAS)
    copies = [
        pltpu.make_async_copy(x_hbm.at[i], o_hbm.at[i], sems.at[i])
        for i in range(n_chunks)
    ]
    for c in copies:                   # issue all DMAs back-to-back
        c.start()
    for c in copies:                   # then drain
        c.wait()


_MAX_OUTSTANDING_DMAS = 4
_MIN_CHUNK_BYTES = 1 << 20             # only split when every chunk is >= 1 MiB


def _num_chunks(total_elems, dtype_bytes):
    total_bytes = total_elems * dtype_bytes
    for cand in (_MAX_OUTSTANDING_DMAS, 2):
        if total_elems % cand == 0 and total_bytes // cand >= _MIN_CHUNK_BYTES:
            return cand
    return 1


def _pallas_materialize(x_flat):
    """Copy a flat buffer into a fresh buffer via direct HBM->HBM DMA."""
    total = x_flat.shape[0]
    dtype_bytes = jnp.dtype(x_flat.dtype).itemsize
    n_chunks = _num_chunks(total, dtype_bytes)
    x2 = x_flat.reshape(n_chunks, total // n_chunks)     # metadata-only
    out = pl.pallas_call(
        _dma_copy_kernel,
        out_shape=jax.ShapeDtypeStruct(x2.shape, x2.dtype),
        in_specs=[pl.BlockSpec(memory_space=pl.ANY)],     # raw HBM ref, no auto-DMA
        out_specs=pl.BlockSpec(memory_space=pl.ANY),      # raw HBM ref, no auto-DMA
        scratch_shapes=[pltpu.SemaphoreType.DMA((n_chunks,))],
        cost_estimate=pl.CostEstimate(
            flops=0, transcendentals=0,
            bytes_accessed=2 * total * dtype_bytes),
    )(x2)
    return out.reshape(-1)


def squeeze_forward(x, factor, logdet=None, reverse=False, materialize=False):
    """Exact semantics of Squeeze.forward (NCHW, pure contiguous view).

    materialize=False (default): metadata-only reshape (the op's true cost: ~0).
    materialize=True:            produce a fresh output buffer via the Pallas
                                 HBM->HBM DMA copy kernel.
    """
    n, c, h, w = x.shape
    if not reverse:
        if factor == 1:
            return x, logdet
        assert h % factor == 0 and w % factor == 0, (
            "h,w not divisible by factor: h=%d, factor=%d" % (h, factor))
        new_shape = (n, c * factor * factor, h // factor, w // factor)
    else:
        if factor == 1:
            return x
        assert c % factor ** 2 == 0, "channels not divisible by factor squared"
        new_shape = (n, c // factor ** 2, h * factor, w * factor)

    if materialize:
        out = _pallas_materialize(x.reshape(-1)).reshape(new_shape)
    else:
        out = x.reshape(new_shape)     # pure view: no kernel, no HBM traffic

    if not reverse:
        return out, logdet
    return out


if __name__ == "__main__":
    key = jax.random.PRNGKey(0)

    n, c, h, w = 2, 4, 16, 16
    factor = 2
    x = jax.random.normal(key, (n, c, h, w), dtype=jnp.float32)
    logdet = jnp.zeros((n,), dtype=jnp.float32)
    ref = x.reshape(n, c * factor * factor, h // factor, w // factor)

    # --- default (view-only) path: what the torch .view() actually is ---
    y_view, ld = squeeze_forward(x, factor, logdet=logdet)
    y_view = jax.block_until_ready(y_view)
    assert y_view.shape == ref.shape
    assert jnp.array_equal(y_view, ref)
    assert jnp.array_equal(ld, logdet)

    # --- Pallas path: gridless HBM->HBM DMA copy kernel, run once ---
    y_pal, ld2 = squeeze_forward(x, factor, logdet=logdet, materialize=True)
    y_pal = jax.block_until_ready(y_pal)
    assert y_pal.shape == ref.shape
    assert jnp.array_equal(y_pal, ref)
    assert jnp.array_equal(ld2, logdet)

    # --- reverse round trip through the Pallas path ---
    x_back = squeeze_forward(y_pal, factor, reverse=True, materialize=True)
    x_back = jax.block_until_ready(x_back)
    assert x_back.shape == (n, c, h, w)
    assert jnp.array_equal(x_back, x)

    # --- odd total (not a multiple of 128): no padding path needed anymore ---
    x2 = jax.random.normal(jax.random.PRNGKey(1), (1, 3, 6, 6), jnp.float32)
    y2, _ = squeeze_forward(x2, 2, materialize=True)
    y2 = jax.block_until_ready(y2)
    assert jnp.array_equal(y2, x2.reshape(1, 12, 3, 3))

    print("KERNEL_OK")
</pallas_src>

<mosaic_0001>
module attributes {stable_mosaic.version = 11 : i64} {
  func.func @_dma_copy_kernel(%arg0: memref<1x2048xf32, #tpu.memory_space<any>>, %arg1: memref<1x2048xf32, #tpu.memory_space<any>>, %arg2: memref<1x!tpu.dma_semaphore, #tpu.memory_space<semaphore_mem>>) attributes {dimension_semantics = [], scalar_prefetch = 0 : i64, scratch_operands = 1 : i64, tpu.core_type = #tpu.core_type<tc>} {
    %c0_i32 = arith.constant 0 : i32
    %c0_i32_0 = arith.constant 0 : i32
    %c0_i32_1 = arith.constant 0 : i32
    %c0_i32_2 = arith.constant 0 : i32
    %0 = tpu.memref_slice %arg0[%c0_i32, %c0_i32_2] : memref<1x2048xf32, #tpu.memory_space<any>> -> memref<1x2048xf32, #tpu.memory_space<any>>
    %1 = tpu.memref_squeeze %0 : memref<1x2048xf32, #tpu.memory_space<any>> -> memref<2048xf32, #tpu.memory_space<any>>
    %c0_i32_3 = arith.constant 0 : i32
    %2 = tpu.memref_slice %arg1[%c0_i32_0, %c0_i32_3] : memref<1x2048xf32, #tpu.memory_space<any>> -> memref<1x2048xf32, #tpu.memory_space<any>>
    %3 = tpu.memref_squeeze %2 : memref<1x2048xf32, #tpu.memory_space<any>> -> memref<2048xf32, #tpu.memory_space<any>>
    %4 = tpu.memref_slice %arg2[%c0_i32_1] : memref<1x!tpu.dma_semaphore, #tpu.memory_space<semaphore_mem>> -> memref<1x!tpu.dma_semaphore, #tpu.memory_space<semaphore_mem>>
    %5 = tpu.memref_squeeze %4 : memref<1x!tpu.dma_semaphore, #tpu.memory_space<semaphore_mem>> -> memref<!tpu.dma_semaphore, #tpu.memory_space<semaphore_mem>>
    tpu.enqueue_dma source(%1 : memref<2048xf32, #tpu.memory_space<any>>) target(%3 : memref<2048xf32, #tpu.memory_space<any>>) target_semaphore(%5 : memref<!tpu.dma_semaphore, #tpu.memory_space<semaphore_mem>>)
    %c0_i32_4 = arith.constant 0 : i32
    %c0_i32_5 = arith.constant 0 : i32
    %c0_i32_6 = arith.constant 0 : i32
    %c0_i32_7 = arith.constant 0 : i32
    %6 = tpu.memref_slice %arg0[%c0_i32_4, %c0_i32_7] : memref<1x2048xf32, #tpu.memory_space<any>> -> memref<1x2048xf32, #tpu.memory_space<any>>
    %7 = tpu.memref_squeeze %6 : memref<1x2048xf32, #tpu.memory_space<any>> -> memref<2048xf32, #tpu.memory_space<any>>
    %c0_i32_8 = arith.constant 0 : i32
    %8 = tpu.memref_slice %arg1[%c0_i32_5, %c0_i32_8] : memref<1x2048xf32, #tpu.memory_space<any>> -> memref<1x2048xf32, #tpu.memory_space<any>>
    %9 = tpu.memref_squeeze %8 : memref<1x2048xf32, #tpu.memory_space<any>> -> memref<2048xf32, #tpu.memory_space<any>>
    %10 = tpu.memref_slice %arg2[%c0_i32_6] : memref<1x!tpu.dma_semaphore, #tpu.memory_space<semaphore_mem>> -> memref<1x!tpu.dma_semaphore, #tpu.memory_space<semaphore_mem>>
    %11 = tpu.memref_squeeze %10 : memref<1x!tpu.dma_semaphore, #tpu.memory_space<semaphore_mem>> -> memref<!tpu.dma_semaphore, #tpu.memory_space<semaphore_mem>>
    tpu.wait_dma2 semaphore(%11 : memref<!tpu.dma_semaphore, #tpu.memory_space<semaphore_mem>>) src(%7 : memref<2048xf32, #tpu.memory_space<any>>) dst(%9 : memref<2048xf32, #tpu.memory_space<any>>)
    return
  }
}

</mosaic_0001>

<bundles_post_ra>
// kernel: tpu_custom_call.1
= control target key start
LH: loop header
LB: loop body
LE: loop exit
PB: predicated region body
PF: predicated region fallthrough
CT: control target
= control target key end

     0   :  { %s33_s6 = smov [#allocation2]   ;;  %s34_s7 = smov [#allocation3]   ;;  %s52_s0 = inlined_call_operand.hbm [shape: f32[1,2048], index: 0, kind: input, shape index: {}]   ;;  %s53_s1 = inlined_call_operand.hbm [shape: f32[1,2048], index: 1, kind: output, shape index: {}]  }
   0x1   :  { %s35_s8 = smov 0  }
   0x2   :  { %18 = dma.general %s52_s0, 256, %s53_s1, %s33_s6, %s34_s7, [#allocation4], %s35_s8, 0  }
   0x3   :  { %31 = dma.done.wait [#allocation2], 256 }
   0x4   :  { %32 = vsyncadd [#allocation2], 4294967040 }
   0x5   :  { %21 = vsyncmov [#allocation2] }
   0x8   :  { %s22_s13 = vpop.sfrf %21 }
   0x9   :  { %p27_p0 = scmp.ne.s32.totalorder %s22_s13, 0 }
   0xb   :  { %26 = shalt.err (%p27_p0)  }

</bundles_post_ra>
